<compile_context>
chip_gen: v7x
topology: tpu7x:2x2x1
jax: 0.10.0
libtpu: 0.0.40
codegen_flags: <defaults>
</compile_context>

<pallas_src>
import functools

import jax
import jax.numpy as jnp
import numpy as np
from jax.experimental import pallas as pl
from jax.experimental.pallas import tpu as pltpu


def _round_up(x, m):
    return (x + m - 1) // m * m


def _mmd_tile_kernel(scale_ref, row_ref, col_ref, r_row_ref, r_col_ref,
                     s_row_ref, s_col_ref, out_ref, *, kernel_mul, kernel_num,
                     batch_size):
    i = pl.program_id(0)
    j = pl.program_id(1)

    @pl.when(jnp.logical_and(i == 0, j == 0))
    def _init():
        out_ref[...] = jnp.zeros_like(out_ref)

    # K (and the +/-1 weighting) is symmetric: only compute tiles with j >= i,
    # count strictly-upper tiles twice.
    @pl.when(j >= i)
    def _compute():
        row = row_ref[...]                                   # (tm, D) f32
        col = col_ref[...]                                   # (tn, D) f32
        # Gram matrix on the MXU: contract the feature axis of both operands.
        gram = jax.lax.dot_general(
            row, col, (((1,), (1,)), ((), ())),
            preferred_element_type=jnp.float32)              # (tm, tn)
        l2 = r_row_ref[...] + r_col_ref[...] - 2.0 * gram
        l2 = jnp.maximum(l2, 0.0)                            # cancellation guard

        # Multi-bandwidth Gaussian kernels: u = -l2 / bw, then constant rescales.
        u = l2 * scale_ref[0, 0]                             # scale = -1/bandwidth
        kmat = jnp.exp(u)
        for p in range(1, kernel_num):
            kmat = kmat + jnp.exp(u * jnp.float32(1.0 / (kernel_mul ** p)))

        # Signed block sum: contribution = s_row^T K s_col (lane reduce on XLU).
        contrib = jnp.sum(
            jnp.sum(kmat * s_col_ref[...], axis=1, keepdims=True) * s_row_ref[...])
        weight = jnp.where(j > i, jnp.float32(2.0), jnp.float32(1.0))
        out_ref[...] += weight * contrib

    @pl.when(jnp.logical_and(i == pl.num_programs(0) - 1,
                             j == pl.num_programs(1) - 1))
    def _finalize():
        out_ref[...] = out_ref[...] / jnp.float32(batch_size * batch_size)


def mmd_loss_pallas(source, target, kernel_mul=2.0, kernel_num=5,
                    fix_sigma=None):
    """MMD loss matching torch MMD_loss.forward(source, target)."""
    assert source.shape == target.shape and source.ndim == 2
    b, d = source.shape
    n = 2 * b
    total = jnp.concatenate([source, target], axis=0).astype(jnp.float32)

    # Row squared norms (reused for both the bandwidth and the distance tiles).
    r = jnp.sum(total * total, axis=1)                       # (n,)

    # Closed-form bandwidth (matches torch: sum(L2) / (n^2 - n)).
    if fix_sigma:
        bandwidth = jnp.float32(fix_sigma)
    else:
        col_sum = jnp.sum(total, axis=0)                     # (d,)
        sum_l2 = 2.0 * n * jnp.sum(r) - 2.0 * jnp.dot(col_sum, col_sum)
        bandwidth = sum_l2 / jnp.float32(n * n - n)
    bandwidth = bandwidth / jnp.float32(kernel_mul ** (kernel_num // 2))
    scale = (-1.0 / bandwidth).astype(jnp.float32).reshape(1, 1)

    # Tile selection: 256 (MXU-friendly on v6e/v7x, 2x128 on v5e), shrink to 128
    # if the (tile, D) double-buffered slabs would not fit a ~24 MiB VMEM budget.
    tile = 256
    while tile > 128 and 4 * tile * d * 4 > 24 * 1024 * 1024:
        tile //= 2
    n_pad8 = _round_up(n, 8)
    if n_pad8 <= tile:
        tm = tn = n_pad8
        n_pad = n_pad8
    else:
        tm = tn = tile
        n_pad = _round_up(n, tile)
    pad = n_pad - n

    total_p = jnp.pad(total, ((0, pad), (0, 0)))
    r_p = jnp.pad(r, (0, pad))
    # +/-1 sign vector (0 on padded rows so padding contributes nothing).
    s = jnp.concatenate([jnp.ones((b,), jnp.float32),
                         -jnp.ones((b,), jnp.float32),
                         jnp.zeros((pad,), jnp.float32)])
    r_row = r_p.reshape(n_pad, 1)
    r_col = r_p.reshape(1, n_pad)
    s_row = s.reshape(n_pad, 1)
    s_col = s.reshape(1, n_pad)

    gi = n_pad // tm
    gj = n_pad // tn

    kernel = functools.partial(
        _mmd_tile_kernel,
        kernel_mul=kernel_mul,
        kernel_num=kernel_num,
        batch_size=b,
    )

    out = pl.pallas_call(
        kernel,
        out_shape=jax.ShapeDtypeStruct((1, 1), jnp.float32),
        grid=(gi, gj),
        in_specs=[
            # -1/bandwidth scalar in SMEM.
            pl.BlockSpec((1, 1), lambda i, j: (0, 0),
                         memory_space=pltpu.MemorySpace.SMEM),
            # Row tile and column tile of `total` (two views of the same array).
            pl.BlockSpec((tm, d), lambda i, j: (i, 0)),
            pl.BlockSpec((tn, d), lambda i, j: (j, 0)),
            # Row norms for the row / column sides.
            pl.BlockSpec((tm, 1), lambda i, j: (i, 0)),
            pl.BlockSpec((1, tn), lambda i, j: (0, j)),
            # +/-1 sign vector for the row / column sides.
            pl.BlockSpec((tm, 1), lambda i, j: (i, 0)),
            pl.BlockSpec((1, tn), lambda i, j: (0, j)),
        ],
        out_specs=pl.BlockSpec((1, 1), lambda i, j: (0, 0)),
        compiler_params=pltpu.CompilerParams(
            dimension_semantics=("arbitrary", "arbitrary"),
            vmem_limit_bytes=64 * 1024 * 1024),
        cost_estimate=pl.CostEstimate(
            flops=2 * n_pad * n_pad * d,
            transcendentals=kernel_num * n_pad * n_pad,
            bytes_accessed=2 * n_pad * d * 4 + 4 * n_pad * 4 + 8),
    )(scale, total_p, total_p, r_row, r_col, s_row, s_col)
    return out[0, 0]


def _mmd_loss_ref(source, target, kernel_mul=2.0, kernel_num=5):
    """Pure-JAX reference mirroring the PyTorch module exactly."""
    b = source.shape[0]
    total = jnp.concatenate([source, target], axis=0)
    n = total.shape[0]
    diff = total[None, :, :] - total[:, None, :]
    l2 = jnp.sum(diff ** 2, axis=2)
    bandwidth = jnp.sum(l2) / (n * n - n)
    bandwidth = bandwidth / (kernel_mul ** (kernel_num // 2))
    kmat = sum(jnp.exp(-l2 / (bandwidth * kernel_mul ** i))
               for i in range(kernel_num))
    xx = kmat[:b, :b]
    yy = kmat[b:, b:]
    xy = kmat[:b, b:]
    yx = kmat[b:, :b]
    return jnp.mean(xx + yy - xy - yx)


if __name__ == "__main__":
    # Small deterministic inputs: batch=8, hidden=32 feature vectors.
    key = jax.random.PRNGKey(0)
    k_src, k_tgt = jax.random.split(key)
    source = jax.random.normal(k_src, (8, 32), dtype=jnp.float32)
    target = jax.random.normal(k_tgt, (8, 32), dtype=jnp.float32) + 0.5

    loss = mmd_loss_pallas(source, target, kernel_mul=2.0, kernel_num=5)
    loss = jax.block_until_ready(loss)

    ref = _mmd_loss_ref(source, target, kernel_mul=2.0, kernel_num=5)
    np.testing.assert_allclose(np.asarray(loss), np.asarray(ref),
                               rtol=2e-4, atol=2e-5)

    print("KERNEL_OK")
</pallas_src>

<mosaic_0001>
module attributes {stable_mosaic.version = 11 : i64} {
  func.func @_mmd_tile_kernel(%arg0: i32, %arg1: i32, %arg2: memref<1x1xf32, #tpu.memory_space<smem>>, %arg3: memref<16x32xf32, #tpu.memory_space<vmem>>, %arg4: memref<16x32xf32, #tpu.memory_space<vmem>>, %arg5: memref<16x1xf32, #tpu.memory_space<vmem>>, %arg6: memref<1x16xf32, #tpu.memory_space<vmem>>, %arg7: memref<16x1xf32, #tpu.memory_space<vmem>>, %arg8: memref<1x16xf32, #tpu.memory_space<vmem>>, %arg9: memref<1x1xf32, #tpu.memory_space<vmem>>) attributes {dimension_semantics = [#tpu.dimension_semantics<arbitrary>, #tpu.dimension_semantics<arbitrary>], iteration_bounds = array<i64: 1, 1>, scalar_prefetch = 0 : i64, scratch_operands = 0 : i64, tpu.core_type = #tpu.core_type<tc>, window_params = [{transform_indices = @transform_0, window_bounds = array<i64: 1, 1>}, {transform_indices = @transform_1, window_bounds = array<i64: 16, 32>}, {transform_indices = @transform_2, window_bounds = array<i64: 16, 32>}, {transform_indices = @transform_3, window_bounds = array<i64: 16, 1>}, {transform_indices = @transform_4, window_bounds = array<i64: 1, 16>}, {transform_indices = @transform_5, window_bounds = array<i64: 16, 1>}, {transform_indices = @transform_6, window_bounds = array<i64: 1, 16>}, {pipeline_mode = #tpu.pipeline_mode<synchronous>, transform_indices = @transform_7, window_bounds = array<i64: 1, 1>}]} {
    %c0_i32 = arith.constant 0 : i32
    %0 = arith.cmpi eq, %arg0, %c0_i32 : i32
    %c0_i32_0 = arith.constant 0 : i32
    %1 = arith.cmpi eq, %arg1, %c0_i32_0 : i32
    %2 = arith.andi %0, %1 : i1
    %3 = arith.extui %2 : i1 to i32
    %c0_i32_1 = arith.constant 0 : i32
    %4 = arith.cmpi ne, %3, %c0_i32_1 : i32
    scf.if %4 {
      %cst = arith.constant 0.000000e+00 : f32
      %13 = vector.broadcast %cst : f32 to vector<1x1xf32>
      %c0 = arith.constant 0 : index
      %c0_6 = arith.constant 0 : index
      %14 = vector.load %arg9[%c0, %c0_6] : memref<1x1xf32, #tpu.memory_space<vmem>>, vector<1x1xf32>
      tpu.vector_store %arg9[%c0, %c0_6], %13 {strides = array<i32>} : memref<1x1xf32, #tpu.memory_space<vmem>>, vector<1x1xf32>,
    } else {
    }
    %5 = arith.cmpi sge, %arg1, %arg0 : i32
    %6 = arith.extui %5 : i1 to i32
    %c0_i32_2 = arith.constant 0 : i32
    %7 = arith.cmpi ne, %6, %c0_i32_2 : i32
    scf.if %7 {
      %c0 = arith.constant 0 : index
      %c0_6 = arith.constant 0 : index
      %13 = vector.load %arg3[%c0, %c0_6] : memref<16x32xf32, #tpu.memory_space<vmem>>, vector<16x32xf32>
      %c0_7 = arith.constant 0 : index
      %c0_8 = arith.constant 0 : index
      %14 = vector.load %arg4[%c0_7, %c0_8] : memref<16x32xf32, #tpu.memory_space<vmem>>, vector<16x32xf32>
      %cst = arith.constant dense<0.000000e+00> : vector<16x16xf32>
      %15 = tpu.matmul %13, %14, %cst {dimension_numbers = #tpu.dot_dimension_numbers<[1], [1], [0], [0], [0, 0, 1, 0], [], []>} : vector<16x32xf32>, vector<16x32xf32>, vector<16x16xf32> -> vector<16x16xf32>
      %c0_9 = arith.constant 0 : index
      %c0_10 = arith.constant 0 : index
      %16 = vector.load %arg5[%c0_9, %c0_10] : memref<16x1xf32, #tpu.memory_space<vmem>>, vector<16x1xf32>
      %c0_11 = arith.constant 0 : index
      %c0_12 = arith.constant 0 : index
      %17 = vector.load %arg6[%c0_11, %c0_12] : memref<1x16xf32, #tpu.memory_space<vmem>>, vector<1x16xf32>
      %18 = vector.broadcast %16 : vector<16x1xf32> to vector<16x16xf32>
      %19 = vector.broadcast %17 : vector<1x16xf32> to vector<16x16xf32>
      %20 = arith.addf %18, %19 : vector<16x16xf32>
      %cst_13 = arith.constant 2.000000e+00 : f32
      %21 = vector.broadcast %cst_13 : f32 to vector<16x16xf32>
      %22 = arith.mulf %21, %15 : vector<16x16xf32>
      %23 = arith.subf %20, %22 : vector<16x16xf32>
      %cst_14 = arith.constant 0.000000e+00 : f32
      %24 = vector.broadcast %cst_14 : f32 to vector<16x16xf32>
      %25 = arith.maximumf %23, %24 : vector<16x16xf32>
      %c0_15 = arith.constant 0 : index
      %c0_16 = arith.constant 0 : index
      %26 = memref.load %arg2[%c0_15, %c0_16] : memref<1x1xf32, #tpu.memory_space<smem>>
      %27 = vector.broadcast %26 : f32 to vector<16x16xf32>
      %28 = arith.mulf %25, %27 : vector<16x16xf32>
      %29 = math.exp %28 : vector<16x16xf32>
      %cst_17 = arith.constant 5.000000e-01 : f32
      %30 = vector.broadcast %cst_17 : f32 to vector<16x16xf32>
      %31 = arith.mulf %28, %30 : vector<16x16xf32>
      %32 = math.exp %31 : vector<16x16xf32>
      %33 = arith.addf %29, %32 : vector<16x16xf32>
      %cst_18 = arith.constant 2.500000e-01 : f32
      %34 = vector.broadcast %cst_18 : f32 to vector<16x16xf32>
      %35 = arith.mulf %28, %34 : vector<16x16xf32>
      %36 = math.exp %35 : vector<16x16xf32>
      %37 = arith.addf %33, %36 : vector<16x16xf32>
      %cst_19 = arith.constant 1.250000e-01 : f32
      %38 = vector.broadcast %cst_19 : f32 to vector<16x16xf32>
      %39 = arith.mulf %28, %38 : vector<16x16xf32>
      %40 = math.exp %39 : vector<16x16xf32>
      %41 = arith.addf %37, %40 : vector<16x16xf32>
      %cst_20 = arith.constant 6.250000e-02 : f32
      %42 = vector.broadcast %cst_20 : f32 to vector<16x16xf32>
      %43 = arith.mulf %28, %42 : vector<16x16xf32>
      %44 = math.exp %43 : vector<16x16xf32>
      %45 = arith.addf %41, %44 : vector<16x16xf32>
      %c0_21 = arith.constant 0 : index
      %c0_22 = arith.constant 0 : index
      %46 = vector.load %arg8[%c0_21, %c0_22] : memref<1x16xf32, #tpu.memory_space<vmem>>, vector<1x16xf32>
      %47 = vector.broadcast %46 : vector<1x16xf32> to vector<16x16xf32>
      %48 = arith.mulf %45, %47 : vector<16x16xf32>
      %cst_23 = arith.constant dense<0.000000e+00> : vector<16xf32>
      %49 = vector.multi_reduction <add>, %48, %cst_23 [1] : vector<16x16xf32> to vector<16xf32>
      %50 = vector.shape_cast %49 : vector<16xf32> to vector<16x1xf32>
      %c0_24 = arith.constant 0 : index
      %c0_25 = arith.constant 0 : index
      %51 = vector.load %arg7[%c0_24, %c0_25] : memref<16x1xf32, #tpu.memory_space<vmem>>, vector<16x1xf32>
      %52 = arith.mulf %50, %51 : vector<16x1xf32>
      %53 = vector.shape_cast %52 : vector<16x1xf32> to vector<1x16x1xf32>
      %cst_26 = arith.constant dense<0.000000e+00> : vector<1xf32>
      %54 = vector.multi_reduction <add>, %53, %cst_26 [1, 2] : vector<1x16x1xf32> to vector<1xf32>
      %55 = vector.shape_cast %54 : vector<1xf32> to vector<1x1x1xf32>
      %56 = vector.extract %55[0, 0, 0] : f32 from vector<1x1x1xf32>
      %57 = arith.cmpi sgt, %arg1, %arg0 : i32
      %cst_27 = arith.constant 2.000000e+00 : f32
      %cst_28 = arith.constant 1.000000e+00 : f32
      %58 = arith.select %57, %cst_27, %cst_28 : f32
      %c0_29 = arith.constant 0 : index
      %c0_30 = arith.constant 0 : index
      %59 = vector.load %arg9[%c0_29, %c0_30] : memref<1x1xf32, #tpu.memory_space<vmem>>, vector<1x1xf32>
      %60 = arith.mulf %58, %56 : f32
      %61 = vector.broadcast %60 : f32 to vector<1x1xf32>
      %62 = arith.addf %59, %61 : vector<1x1xf32>
      %c0_31 = arith.constant 0 : index
      %c0_32 = arith.constant 0 : index
      %63 = vector.load %arg9[%c0_31, %c0_32] : memref<1x1xf32, #tpu.memory_space<vmem>>, vector<1x1xf32>
      tpu.vector_store %arg9[%c0_31, %c0_32], %62 {strides = array<i32>} : memref<1x1xf32, #tpu.memory_space<vmem>>, vector<1x1xf32>,
    } else {
    }
    %c0_i32_3 = arith.constant 0 : i32
    %8 = arith.cmpi eq, %arg0, %c0_i32_3 : i32
    %c0_i32_4 = arith.constant 0 : i32
    %9 = arith.cmpi eq, %arg1, %c0_i32_4 : i32
    %10 = arith.andi %8, %9 : i1
    %11 = arith.extui %10 : i1 to i32
    %c0_i32_5 = arith.constant 0 : i32
    %12 = arith.cmpi ne, %11, %c0_i32_5 : i32
    scf.if %12 {
      %c0 = arith.constant 0 : index
      %c0_6 = arith.constant 0 : index
      %13 = vector.load %arg9[%c0, %c0_6] : memref<1x1xf32, #tpu.memory_space<vmem>>, vector<1x1xf32>
      %cst = arith.constant 6.400000e+01 : f32
      %14 = vector.broadcast %cst : f32 to vector<1x1xf32>
      %15 = arith.divf %13, %14 : vector<1x1xf32>
      %c0_7 = arith.constant 0 : index
      %c0_8 = arith.constant 0 : index
      %16 = vector.load %arg9[%c0_7, %c0_8] : memref<1x1xf32, #tpu.memory_space<vmem>>, vector<1x1xf32>
      tpu.vector_store %arg9[%c0_7, %c0_8], %15 {strides = array<i32>} : memref<1x1xf32, #tpu.memory_space<vmem>>, vector<1x1xf32>,
    } else {
    }
    return
  }
  func.func @transform_0(%arg0: i32, %arg1: i32) -> (i32, i32) {
    %c0_i32 = arith.constant 0 : i32
    %c0_i32_0 = arith.constant 0 : i32
    %c0_i32_1 = arith.constant 0 : i32
    return %c0_i32, %c0_i32_0 : i32, i32
  }
  func.func @transform_1(%arg0: i32, %arg1: i32) -> (i32, i32) {
    %c0_i32 = arith.constant 0 : i32
    %c0_i32_0 = arith.constant 0 : i32
    return %arg0, %c0_i32 : i32, i32
  }
  func.func @transform_2(%arg0: i32, %arg1: i32) -> (i32, i32) {
    %c0_i32 = arith.constant 0 : i32
    %c0_i32_0 = arith.constant 0 : i32
    return %arg1, %c0_i32 : i32, i32
  }
  func.func @transform_3(%arg0: i32, %arg1: i32) -> (i32, i32) {
    %c0_i32 = arith.constant 0 : i32
    %c0_i32_0 = arith.constant 0 : i32
    return %arg0, %c0_i32 : i32, i32
  }
  func.func @transform_4(%arg0: i32, %arg1: i32) -> (i32, i32) {
    %c0_i32 = arith.constant 0 : i32
    %c0_i32_0 = arith.constant 0 : i32
    return %c0_i32, %arg1 : i32, i32
  }
  func.func @transform_5(%arg0: i32, %arg1: i32) -> (i32, i32) {
    %c0_i32 = arith.constant 0 : i32
    %c0_i32_0 = arith.constant 0 : i32
    return %arg0, %c0_i32 : i32, i32
  }
  func.func @transform_6(%arg0: i32, %arg1: i32) -> (i32, i32) {
    %c0_i32 = arith.constant 0 : i32
    %c0_i32_0 = arith.constant 0 : i32
    return %c0_i32, %arg1 : i32, i32
  }
  func.func @transform_7(%arg0: i32, %arg1: i32) -> (i32, i32) {
    %c0_i32 = arith.constant 0 : i32
    %c0_i32_0 = arith.constant 0 : i32
    %c0_i32_1 = arith.constant 0 : i32
    return %c0_i32, %c0_i32_0 : i32, i32
  }
}

</mosaic_0001>

<bundles_post_ra>
// kernel: tpu_custom_call.1
= control target key start
LH: loop header
LB: loop body
LE: loop exit
PB: predicated region body
PF: predicated region fallthrough
CT: control target
= control target key end

     0   :  { %13 = vsyncpa [#allocation4], 0  ;;  %s732_s0 = inlined_call_operand.<no memory space> [shape: f32[1,1], index: 0, kind: input, shape index: {}]   ;;  %s733_s1 = inlined_call_operand.hbm [shape: f32[16,32], index: 1, kind: input, shape index: {}]   ;;  %s734_s2 = inlined_call_operand.hbm [shape: f32[16,32], index: 2, kind: input, shape index: {}]   ;;  %s735_s3 = inlined_call_operand.hbm [shape: f32[16,1], index: 3, kind: input, shape index: {}]   ;;  %s736_s4 = inlined_call_operand.hbm [shape: f32[1,16], index: 4, kind: input, shape index: {}]   ;;  %s737_s5 = inlined_call_operand.hbm [shape: f32[16,1], index: 5, kind: input, shape index: {}]   ;;  %s738_s6 = inlined_call_operand.hbm [shape: f32[1,16], index: 6, kind: input, shape index: {}]   ;;  %s739_s7 = inlined_call_operand.hbm [shape: f32[1,1], index: 7, kind: output, shape index: {}]  }
   0x1   :  { %14 = vsyncpa [#allocation7], 0 }
   0x2   :  { %15 = vsyncpa [#allocation10], 0 }
   0x3   :  { %16 = vsyncpa [#allocation13], 0 }
   0x4   :  { %17 = vsyncpa [#allocation5], 0  ;;  %s564_s24 = smov [#allocation6]   ;;  %s565_s26 = smov [#allocation9]  }
   0x5   :  { %s37_s25 = sshll.u32 %s564_s24, 4  ;;  %s62_s27 = sshll.u32 %s565_s26, 4  ;;  %s38_s25 = int_to_ptr.vmem [resolvable:$true] %s37_s25  ;;  %s615_s27 = int_to_ptr.vmem [resolvable:$true] %s62_s27 }
   0x6   :  { %s400_s30 = scalar_lea.hbm %s734_s2, 256 }
   0x7   :  { %p401_p0 = scmp.ne.s32.totalorder %s734_s2, %s400_s30  ;;  %p404_p1 = scmp.lt.u32.totalorder %s400_s30, %s734_s2 }
   0x9   :  { %p406_p2 = pnand %p404_p1, %p401_p0 }
   0xb   :  { %409 = shalt.err (!%p406_p2)
}
   0xc   :  { %s410_s12 = scalar_lea.vmem %s38_s25, 256  ;;  %p415_p4 = scmp.lt.s32.totalorder %s38_s25, %s38_s25 }
   0xd   :  { %p411_p3 = scmp.ne.s32.totalorder %s38_s25, %s410_s12  ;;  %p416_p5 = scmp.lt.s32.totalorder %s410_s12, %s410_s12 }
   0xf   :  { %p417_p6 = por %p416_p5, %p415_p4 }
  0x11   :  { %p418_p7 = pnand %p417_p6, %p411_p3 }
  0x13   :  { %421 = shalt.err (!%p418_p7)
}
  0x14   :  { %s566_s13 = smov 128   ;;  %s567_s14 = smov 8  }
  0x15   :  { %43 = dma.hbm_to_vmem [thread:$0]  %s734_s2, 256, %s38_s25, [#allocation7], %s566_s13, %s566_s13, %s567_s14  }
  0x16   :  { %s422_s19 = scalar_lea.hbm %s736_s4, 16 }
  0x17   :  { %p423_p8 = scmp.ne.s32.totalorder %s736_s4, %s422_s19  ;;  %p426_p9 = scmp.lt.u32.totalorder %s422_s19, %s736_s4 }
  0x19   :  { %p428_p10 = pnand %p426_p9, %p423_p8 }
  0x1b   :  { %431 = shalt.err (!%p428_p10)
}
  0x1c   :  { %s432_s24 = scalar_lea.vmem %s615_s27, 16  ;;  %s436_s2 = scalar_lea.vmem %s615_s27, 32 }
  0x1d   :  { %p433_p11 = scmp.ne.s32.totalorder %s615_s27, %s432_s24  ;;  %p437_p12 = scmp.lt.s32.totalorder %s615_s27, %s615_s27 }
  0x1e   :  { %p438_p13 = scmp.lt.s32.totalorder %s436_s2, %s432_s24 }
  0x20   :  { %p439_p0 = por %p438_p13, %p437_p12 }
  0x22   :  { %p440_p1 = pnand %p439_p0, %p433_p11 }
  0x24   :  { %443 = shalt.err (!%p440_p1)
}
  0x25   :  { %65 = dma.hbm_to_vmem [thread:$0]  %s736_s4, 16, %s615_s27, [#allocation10]  }
  0x26   :  { %s568_s28 = smov [#allocation3]   ;;  %s569_s30 = smov [#allocation8]  }
  0x27   :  { %s25_s29 = sshll.u32 %s568_s28, 4  ;;  %s49_s8 = sshll.u32 %s569_s30, 4  ;;  %s26_s29 = int_to_ptr.vmem [resolvable:$true] %s25_s29  ;;  %s650_s8 = int_to_ptr.vmem [resolvable:$true] %s49_s8 }
  0x28   :  { %s444_s11 = scalar_lea.hbm %s733_s1, 256 }
  0x29   :  { %p445_p2 = scmp.ne.s32.totalorder %s733_s1, %s444_s11  ;;  %p448_p3 = scmp.lt.u32.totalorder %s444_s11, %s733_s1 }
  0x2b   :  { %p450_p4 = pnand %p448_p3, %p445_p2 }
  0x2d   :  { %453 = shalt.err (!%p450_p4)
}
  0x2e   :  { %s454_s4 = scalar_lea.vmem %s26_s29, 256  ;;  %p459_p6 = scmp.lt.s32.totalorder %s26_s29, %s26_s29 }
  0x2f   :  { %p455_p5 = scmp.ne.s32.totalorder %s26_s29, %s454_s4  ;;  %p460_p7 = scmp.lt.s32.totalorder %s454_s4, %s454_s4 }
  0x31   :  { %p461_p8 = por %p460_p7, %p459_p6 }
  0x33   :  { %p462_p9 = pnand %p461_p8, %p455_p5 }
  0x35   :  { %465 = shalt.err (!%p462_p9)
}
  0x36   :  { %31 = dma.hbm_to_vmem [thread:$0]  %s733_s1, 256, %s26_s29, [#allocation4], %s566_s13, %s566_s13, %s567_s14  }
  0x37   :  { %s466_s21 = scalar_lea.hbm %s735_s3, 256 }
  0x38   :  { %p467_p10 = scmp.ne.s32.totalorder %s735_s3, %s466_s21  ;;  %p470_p11 = scmp.lt.u32.totalorder %s466_s21, %s735_s3 }
  0x3a   :  { %p472_p12 = pnand %p470_p11, %p467_p10 }
  0x3c   :  { %475 = shalt.err (!%p472_p12)
}
  0x3d   :  { %s476_s25 = scalar_lea.vmem %s650_s8, 256  ;;  %p481_p0 = scmp.lt.s32.totalorder %s650_s8, %s650_s8 }
  0x3e   :  { %p477_p13 = scmp.ne.s32.totalorder %s650_s8, %s476_s25  ;;  %p482_p1 = scmp.lt.s32.totalorder %s476_s25, %s476_s25 }
  0x40   :  { %p483_p2 = por %p482_p1, %p481_p0 }
  0x42   :  { %p484_p3 = pnand %p483_p2, %p477_p13 }
  0x44   :  { %487 = shalt.err (!%p484_p3)
}
  0x45   :  { %55 = dma.hbm_to_vmem [thread:$0]  %s735_s3, 256, %s650_s8, [#allocation7], %s566_s13, %s566_s13, %s567_s14  }
  0x46   :  { %s570_s28 = smov [#allocation11]   ;;  %s571_s30 = smov [#allocation12]  }
  0x47   :  { %s71_s29 = sshll.u32 %s570_s28, 4  ;;  %s84_s9 = sshll.u32 %s571_s30, 4  ;;  %s72_s29 = int_to_ptr.vmem [resolvable:$true] %s71_s29  ;;  %s85_s9 = int_to_ptr.vmem [resolvable:$true] %s84_s9 }
  0x48   :  { %s488_s12 = scalar_lea.hbm %s737_s5, 256 }
  0x49   :  { %p489_p4 = scmp.ne.s32.totalorder %s737_s5, %s488_s12  ;;  %p492_p5 = scmp.lt.u32.totalorder %s488_s12, %s737_s5 }
  0x4b   :  { %p494_p6 = pnand %p492_p5, %p489_p4 }
  0x4d   :  { %497 = shalt.err (!%p494_p6)
}
  0x4e   :  { %s498_s3 = scalar_lea.vmem %s72_s29, 256  ;;  %p503_p8 = scmp.lt.s32.totalorder %s72_s29, %s72_s29 }
  0x4f   :  { %p499_p7 = scmp.ne.s32.totalorder %s72_s29, %s498_s3  ;;  %p504_p9 = scmp.lt.s32.totalorder %s498_s3, %s498_s3 }
  0x51   :  { %p505_p10 = por %p504_p9, %p503_p8 }
  0x53   :  { %p506_p11 = pnand %p505_p10, %p499_p7 }
  0x55   :  { %509 = shalt.err (!%p506_p11)
}
  0x56   :  { %77 = dma.hbm_to_vmem [thread:$0]  %s737_s5, 256, %s72_s29, [#allocation10], %s566_s13, %s566_s13, %s567_s14  }
  0x57   :  { %s510_s20 = scalar_lea.hbm %s738_s6, 16 }
  0x58   :  { %p511_p12 = scmp.ne.s32.totalorder %s738_s6, %s510_s20  ;;  %p514_p13 = scmp.lt.u32.totalorder %s510_s20, %s738_s6 }
  0x5a   :  { %p516_p0 = pnand %p514_p13, %p511_p12 }
  0x5c   :  { %519 = shalt.err (!%p516_p0)
}
  0x5d   :  { %s520_s2 = scalar_lea.vmem %s85_s9, 16  ;;  %s524_s25 = scalar_lea.vmem %s85_s9, 32 }
  0x5e   :  { %p521_p1 = scmp.ne.s32.totalorder %s85_s9, %s520_s2  ;;  %p525_p2 = scmp.lt.s32.totalorder %s85_s9, %s85_s9 }
  0x5f   :  { %p526_p3 = scmp.lt.s32.totalorder %s524_s25, %s520_s2 }
  0x61   :  { %p527_p4 = por %p526_p3, %p525_p2 }
  0x63   :  { %p528_p5 = pnand %p527_p4, %p521_p1 }
  0x65   :  { %531 = shalt.err (!%p528_p5)
}
  0x66   :  { %87 = dma.hbm_to_vmem [thread:$0]  %s738_s6, 16, %s85_s9, [#allocation13]  }
  0x67   :  { %554 = dma.done.wait [#allocation4], 256  }
  0x68   :  { %555 = vsyncadd [#allocation4], 4294967040 }
  0x69   :  { %556 = dma.done.wait [#allocation7], 512  }
  0x6a   :  { %557 = vsyncadd [#allocation7], 4294966784 }
  0x6b   :  { %558 = dma.done.wait [#allocation10], 272  }
  0x6c   :  { %559 = vsyncadd [#allocation10], 4294967024 }
  0x6d   :  { %560 = dma.done.wait [#allocation13], 16  }
  0x6e   :  { %561 = vsyncadd [#allocation13], 4294967280  ;;  %v572_v0 = vmov 0   ;;  %vm122_vm0 = vcmask 261120   ;;  %v120_v1 = vld [vmem:[#allocation6] sm:$0xff]  ;;  %v121_v2 = vld [vmem:[#allocation6 + $0x8] sm:$0xff]  ;;  %v238_v18 = vstv %s732_s0 }
  0x6f   :  { %379 = vset.pattern.permute.xlu0 %v572_v0  ;;  %vm361_vm1 = vmpackc.low %vm122_vm0, %vm122_vm0  ;;  %v118_v3 = vld [vmem:[#allocation3] sm:$0xff]  ;;  %v360_v4 = vpack.c.bf16 %v121_v2, %v120_v1  ;;  %v211_v6 = vld [vmem:[#allocation8 + $0x8] sm:$0xff]  ;;  %vm286_vm2 = vcmask 130048   ;;  %vm297_vm3 = vcmask 7168   ;;  %vm112_vm4 = vcmask 0   ;;  %s574_s1 = smov [#allocation14]  }
  0x70   :  { %357 = vmatprep.mubr.msk.f32.mxu0 %vm122_vm0, %v118_v3  ;;  %v210_v5 = vld [vmem:[#allocation8] sm:$0xff]  ;;  %v119_v7 = vld [vmem:[#allocation3 + $0x8] sm:$0xff]  ;;  %v347_v9 = vld [vmem:[#allocation9] ss:$0 sm:$0xff]  ;;  %s331_s26 = sshll.u32 %s574_s1, 4  ;;  %s332_s26 = int_to_ptr.vmem [resolvable:$true] %s331_s26 }
  0x71   :  { %215 = vperm.xlu0 %379, %v210_v5   ;;  %362 = vmatprep.subr.msk.bf16.mxu0 %vm361_vm1, %v360_v4  ;;  %v348_v58 = vld [vmem:[#allocation12] ss:$0 sm:$0xff]  ;;  %v293_v1 = vld [vmem:[#allocation11] sm:$0xff]  ;;  %v294_v3 = vld [vmem:[#allocation11 + $0x8] sm:$0xff]  ;;  %s532_s28 = scalar_lea.vmem %s332_s26, 16  ;;  %s536_s29 = scalar_lea.vmem %s332_s26, 32 }
  0x72   :  { %365 = vmatpush3.bf16.xpose.msk.msra.mxu0 %vm361_vm1, %v360_v4  ;;  %p533_p6 = scmp.ne.s32.totalorder %s332_s26, %s532_s28  ;;  %p537_p7 = scmp.lt.s32.totalorder %s332_s26, %s332_s26 }
  0x73   :  { %p538_p8 = scmp.lt.s32.totalorder %s536_s29, %s532_s28 }
  0x75   :  { %220 = vperm.xlu0 %379, %v211_v6   ;;  %p539_p9 = por %p538_p8, %p537_p7 }
  0x77   :  { %p540_p10 = pnand %p539_p9, %p533_p6 }
  0x79   :  { %358 = vmatmul.mubr.msk.f32.vlgmr.msra.gmra.mrb[0].mxu0 %vm122_vm0, %v119_v7 }
  0xf0   :  { %v216_v8 = vpop.permute.xlu0 %215 }
  0xf1   :  { %v229_v12 = vadd.f32 %v347_v9, %v216_v8 }
  0xf4   :  { %v221_v10 = vpop.permute.xlu0 %220 }
  0xf5   :  { %v230_v11 = vadd.f32 %v347_v9, %v221_v10  ;;  %v573_v10 = vmov 0.0  }
  0xf6   :  { %113 = vst.msk [vmem:[#allocation14] sm:$0x1] %vm112_vm4, %v573_v10 }
 0x14c   :  { %v359_v13 = vpop.f32.mrb[0].mxu0 }
 0x14d   :  { %v232_v14 = vmul.f32 2.0, %v359_v13  ;;  %v201_v15 = vpop.f32.mrb[1].mxu0 }
 0x14e   :  { %v231_v16 = vmul.f32 2.0, %v201_v15 }
 0x14f   :  { %v234_v17 = vsub.f32 %v230_v11, %v232_v14 }
 0x150   :  { %v233_v19 = vsub.f32 %v229_v12, %v231_v16 }
 0x151   :  { %v236_v20 = vmax.f32 %v234_v17, 0.0 }
 0x152   :  { %v235_v21 = vmax.f32 %v233_v19, 0.0 }
 0x153   :  { %v240_v22 = vmul.f32 %v238_v18, %v236_v20 }
 0x154   :  { %v239_v23 = vmul.f32 %v238_v18, %v235_v21  ;;  %v312_v18 = vld [vmem:[#allocation14] sm:$0x1] }
 0x155   :  { %v243_v24 = vmul.f32 1.442695, %v240_v22  ;;  %v246_v25 = vmul.f32 0.5, %v240_v22  ;;  %v254_v26 = vmul.f32 0.25, %v240_v22  ;;  %v262_v33 = vmul.f32 0.125, %v240_v22 }
 0x156   :  { %v241_v27 = vmul.f32 1.442695, %v239_v23  ;;  %v245_v28 = vmul.f32 0.5, %v239_v23  ;;  %v253_v29 = vmul.f32 0.25, %v239_v23  ;;  %v261_v30 = vmul.f32 0.125, %v239_v23 }
 0x157   :  { %380 = vpow2.f32 %v243_v24  ;;  %v249_v31 = vmul.f32 1.442695, %v246_v25  ;;  %v257_v32 = vmul.f32 1.442695, %v254_v26  ;;  %v269_v35 = vmul.f32 0.0625, %v239_v23 }
 0x158   :  { %382 = vpow2.f32 %v241_v27  ;;  %v247_v34 = vmul.f32 1.442695, %v245_v28  ;;  %v255_v36 = vmul.f32 1.442695, %v253_v29  ;;  %v270_v37 = vmul.f32 0.0625, %v240_v22 }
 0x159   :  { %384 = vpow2.f32 %v249_v31  ;;  %v263_v38 = vmul.f32 1.442695, %v261_v30  ;;  %v265_v39 = vmul.f32 1.442695, %v262_v33  ;;  %v271_v40 = vmul.f32 1.442695, %v269_v35 }
 0x15a   :  { %386 = vpow2.f32 %v257_v32  ;;  %v273_v41 = vmul.f32 1.442695, %v270_v37 }
 0x15b   :  { %388 = vpow2.f32 %v247_v34 }
 0x15c   :  { %390 = vpow2.f32 %v255_v36 }
 0x15d   :  { %392 = vpow2.f32 %v263_v38 }
 0x15e   :  { %394 = vpow2.f32 %v265_v39 }
 0x15f   :  { %396 = vpow2.f32 %v271_v40 }
 0x160   :  { %398 = vpow2.f32 %v273_v41 }
 0x161   :  { %v381_v42 = vpop.eup %380 }
 0x162   :  { %v383_v43 = vpop.eup %382 }
 0x163   :  { %v385_v44 = vpop.eup %384 }
 0x164   :  { %v387_v45 = vpop.eup %386  ;;  %v252_v46 = vadd.f32 %v385_v44, %v381_v42 }
 0x165   :  { %v389_v47 = vpop.eup %388 }
 0x166   :  { %v251_v48 = vadd.f32 %v389_v47, %v383_v43  ;;  %v260_v49 = vadd.f32 %v387_v45, %v252_v46  ;;  %v391_v50 = vpop.eup %390 }
 0x167   :  { %v393_v51 = vpop.eup %392 }
 0x168   :  { %v259_v52 = vadd.f32 %v391_v50, %v251_v48  ;;  %v395_v53 = vpop.eup %394 }
 0x169   :  { %v397_v54 = vpop.eup %396  ;;  %v268_v56 = vadd.f32 %v395_v53, %v260_v49 }
 0x16a   :  { %v267_v55 = vadd.f32 %v393_v51, %v259_v52  ;;  %v399_v57 = vpop.eup %398 }
 0x16b   :  { %v276_v60 = vadd.f32 %v399_v57, %v268_v56 }
 0x16c   :  { %v275_v59 = vadd.f32 %v397_v54, %v267_v55 }
 0x16d   :  { %v285_v63 = vmul.f32 %v348_v58, %v276_v60 }
 0x16e   :  { %v284_v61 = vmul.f32 %v348_v58, %v275_v59 }
 0x16f   :  { %v290_v0 = vsel %vm286_vm2, %v285_v63, 0.0 }
 0x170   :  { %v287_v62 = vsel %vm286_vm2, %v284_v61, 0.0 }
 0x171   :  { %288 = vadd.xlane.f32.xlu1 %v287_v62 }
 0x175   :  { %291 = vadd.xlane.f32.xlu1 %v290_v0 }
 0x1fe   :  { %v289_v2 = vpop.xlane.xlu1 %288 }
 0x1ff   :  { %v295_v4 = vmul.f32 %v293_v1, %v289_v2 }
 0x201   :  { %v298_v7 = vsel %vm297_vm3, %v295_v4, 0.0 }
 0x202   :  { %v292_v5 = vpop.xlane.xlu1 %291 }
 0x203   :  { %v296_v6 = vmul.f32 %v294_v3, %v292_v5 }
 0x205   :  { %v299_v8 = vsel %vm297_vm3, %v296_v6, 0.0 }
 0x206   :  { %v300_v9 = vadd.f32 %v299_v8, %v298_v7 }
 0x208   :  { %301 = vadd.xlane.f32.xlu0 %v300_v9 }
 0x295   :  { %v302_v11 = vpop.xlane.xlu0 %301 }
 0x296   :  { %v303_v12 = vrot.slane %v302_v11, 4 }
 0x298   :  { %v304_v13 = vadd.f32 %v303_v12, %v302_v11 }
 0x29a   :  { %v305_v14 = vrot.slane %v304_v13, 2 }
 0x29c   :  { %v306_v15 = vadd.f32 %v305_v14, %v304_v13 }
 0x29e   :  { %v307_v16 = vrot.slane %v306_v15, 1 }
 0x2a0   :  { %v308_v17 = vadd.f32 %v307_v16, %v306_v15 }
 0x2a2   :  { %366 = vpush %v308_v17 }
 0x2d3   :  { %s367_s0 = spop %366 }
 0x2d4   :  { %v314_v19 = vstv %s367_s0 }
 0x2d5   :  { %v315_v20 = vadd.f32 %v314_v19, %v312_v18 }
 0x2d7   :  { %317 = vst.msk [vmem:[#allocation14] sm:$0x1] %vm112_vm4, %v315_v20 }
 0x2de   :  { %v320_v21 = vld [vmem:[#allocation14] sm:$0x1] }
 0x2df   :  { %v322_v22 = vmul.f32 0.015625, %v320_v21 }
 0x2e1   :  { %324 = vst.msk [vmem:[#allocation14] sm:$0x1] %vm112_vm4, %v322_v22 }
 0x2e2   :  { %543 = shalt.err (!%p540_p10)
}
 0x2e3   :  { %s544_s10 = scalar_lea.hbm %s739_s7, 16 }
 0x2e4   :  { %p545_p11 = scmp.ne.s32.totalorder %s739_s7, %s544_s10  ;;  %p548_p12 = scmp.lt.u32.totalorder %s544_s10, %s739_s7 }
 0x2e6   :  { %p550_p13 = pnand %p548_p12, %p545_p11 }
 0x2e8   :  { %553 = shalt.err (!%p550_p13)
}
 0x2e9   :  { %334 = dma.vmem_to_hbm [thread:$0]  %s332_s26, 16, %s739_s7, [#allocation5]  }
 0x2ea   :  { %562 = dma.done.wait [#allocation5], 16  }
 0x2eb   :  { %563 = vsyncadd [#allocation5], 4294967280 }
 0x2ec   :  { %338 = vsyncpa [#allocation4], 1 }
 0x2ed   :  { %339 = vsyncpa [#allocation7], 1 }
 0x2ee   :  { %340 = vsyncpa [#allocation10], 1 }
 0x2ef   :  { %341 = vsyncpa [#allocation13], 1 }
 0x2f0   :  { %342 = vsyncpa [#allocation5], 1 }

</bundles_post_ra>
